<compile_context>
chip_gen: v5e
topology: v5e:2x2
jax: 0.10.0
libtpu: 0.0.40
codegen_flags: <defaults>
</compile_context>

<pallas_src>
import jax
import jax.numpy as jnp
import numpy as np
from jax.experimental import pallas as pl
from jax.experimental.pallas import tpu as pltpu

_BN_EPS = 1e-4
# bf16 MXU feed per the perf review (wrapper-side casts; f32 accumulation).
_MXU_DTYPE = jnp.bfloat16


# ---------------------------------------------------------------------------
# Fused Pallas kernel (whole ResDown block, one invocation)
# ---------------------------------------------------------------------------
def _make_resdown_kernel(n, ho, wo, c1, c2, c1_pad, p_stride):
    m = n * ho * wo                      # pixels live on the lane axis
    inv_m = 1.0 / float(m)
    pow2 = ((wo & (wo - 1)) == 0) and ((ho & (ho - 1)) == 0)
    wo_shift = wo.bit_length() - 1

    def bn_elu(z, g, be):
        # BatchNorm (training-mode batch stats, biased variance like PyTorch) + ELU.
        # One-pass variance: two independent lane reductions (no serial center
        # -> square -> reduce chain on the XLU critical path).
        s1 = jnp.sum(z, axis=1, keepdims=True)
        s2 = jnp.sum(z * z, axis=1, keepdims=True)
        mean = s1 * inv_m
        var = jnp.maximum(s2 * inv_m - mean * mean, 0.0)
        y = (z - mean) * jax.lax.rsqrt(var + _BN_EPS) * g + be
        # ELU(alpha=1); clamp the exp argument so the unused branch never overflows.
        return jnp.where(y > 0.0, y, jnp.exp(jnp.minimum(y, 0.0)) - 1.0)

    def kernel(p1_ref, w13_ref, w2_ref, bn_ref, o_ref, tap_ref):
        # ---- stage 1: conv1 & conv3 as ONE matmul over the shared patches ----
        h13 = jnp.dot(w13_ref[...], p1_ref[...],
                      preferred_element_type=jnp.float32)        # (C1pad+C2, M) f32
        h1 = h13[0:c1, :]                                        # (C1, M)
        skip = h13[c1_pad:c1_pad + c2, :]                        # (C2, M)

        # ---- bn1 + ELU (reduction over the pixel/lane axis, f32) -------------
        g1 = bn_ref[0:c1, :]
        be1 = bn_ref[p_stride:p_stride + c1, :]
        a1 = bn_elu(h1, g1, be1)                                 # (C1, M) f32

        # ---- conv2 im2col in-kernel: 9 rolled+masked taps stacked on sublanes -
        # Border masks from shift/and (single VPU ops) when ho/wo are powers of
        # two; //,% fallback otherwise.
        lane = jax.lax.broadcasted_iota(jnp.int32, (1, m), 1)
        if pow2:
            w_idx = lane & (wo - 1)
            h_idx = (lane >> wo_shift) & (ho - 1)
        else:
            w_idx = lane % wo
            h_idx = (lane // wo) % ho
        for kh in range(3):
            for kw in range(3):
                oh, ow = kh - 1, kw - 1
                delta = oh * wo + ow
                tap = a1 if delta == 0 else pltpu.roll(a1, (-delta) % m, axis=1)
                valid = ((h_idx + oh >= 0) & (h_idx + oh < ho) &
                         (w_idx + ow >= 0) & (w_idx + ow < wo))
                t = kh * 3 + kw
                tap_ref[t * c1:(t + 1) * c1, :] = jnp.where(valid, tap, 0.0)

        # ---- conv2 as ONE K = 9*C1 matmul; skip seeds the accumulator --------
        # Single cast of the stacked taps to the MXU feed dtype.
        acc = skip + jnp.dot(w2_ref[...], tap_ref[...].astype(_MXU_DTYPE),
                             preferred_element_type=jnp.float32)  # (C2, M) f32

        # ---- bn2 + ELU, lane-dense store (last dim = M, multiple of 128) -----
        g2 = bn_ref[2 * p_stride:2 * p_stride + c2, :]
        be2 = bn_ref[3 * p_stride:3 * p_stride + c2, :]
        o_ref[...] = bn_elu(acc, g2, be2)

    return kernel


# ---------------------------------------------------------------------------
# JAX glue: shared stage-1 im2col, built directly in (9*Cin, M) layout from NCHW
# ---------------------------------------------------------------------------
def _stage1_patches_T(x_nchw, k=3, stride=2, pad=1):
    N, Cin, H, W = x_nchw.shape
    Ho = (H + 2 * pad - k) // stride + 1
    Wo = (W + 2 * pad - k) // stride + 1
    xp = jnp.pad(x_nchw, ((0, 0), (0, 0), (pad, pad), (pad, pad)))
    taps = []
    for kh in range(k):
        for kw in range(k):
            s = jax.lax.slice(
                xp, (0, 0, kh, kw),
                (N, Cin, kh + (Ho - 1) * stride + 1, kw + (Wo - 1) * stride + 1),
                (1, 1, stride, stride))                           # (N, Cin, Ho, Wo)
            taps.append(jnp.transpose(s, (1, 0, 2, 3)).reshape(Cin, N * Ho * Wo))
    # rows ordered (tap, cin); columns are pixels flattened as n*Ho*Wo + h*Wo + w
    return jnp.concatenate(taps, axis=0), (N, Ho, Wo)


def res_down_forward(x_nchw, p):
    """Forward pass of ResDown. Input/output are NCHW, like the PyTorch module."""
    x = x_nchw.astype(jnp.float32)
    c1 = p["w1"].shape[0]            # channel_out // 2
    c2 = p["w2"].shape[0]            # channel_out
    cin = p["w1"].shape[1]

    patches, (n, ho, wo) = _stage1_patches_T(x)                   # (9*Cin, M) f32
    m = n * ho * wo

    # Weight prep (PyTorch OIHW -> matmul layouts). Conv biases are intentionally
    # dropped: per-channel constants added before training-mode BatchNorm are
    # exactly cancelled by the batch-mean subtraction (b1 by bn1, b2+b3 by bn2).
    c1_pad = ((c1 + 7) // 8) * 8
    w1t = jnp.transpose(p["w1"], (0, 2, 3, 1)).reshape(c1, 9 * cin)
    w3t = jnp.transpose(p["w3"], (0, 2, 3, 1)).reshape(c2, 9 * cin)
    # conv1 + conv3 stacked into one LHS (C1 rows padded to a sublane multiple
    # so both in-kernel row slices start 8-aligned).
    w13 = jnp.zeros((c1_pad + c2, 9 * cin), jnp.float32)
    w13 = w13.at[0:c1].set(w1t).at[c1_pad:].set(w3t)
    # conv2 reshaped for the single K = 9*C1 contraction; column order
    # (tap-major, ci-minor) matches the in-kernel tap stacking.
    w2m = jnp.transpose(p["w2"], (0, 2, 3, 1)).reshape(c2, 9 * c1)

    # All four BN scale/shift vectors packed into ONE column array with
    # 8-aligned groups (one DMA instead of four padded (C,1) tiles).
    pstr = max(8, ((max(c1, c2) + 7) // 8) * 8)
    bn = jnp.zeros((4 * pstr, 1), jnp.float32)
    bn = bn.at[0:c1, 0].set(p["g1"])
    bn = bn.at[pstr:pstr + c1, 0].set(p["be1"])
    bn = bn.at[2 * pstr:2 * pstr + c2, 0].set(p["g2"])
    bn = bn.at[3 * pstr:3 * pstr + c2, 0].set(p["be2"])

    out_cm = pl.pallas_call(
        _make_resdown_kernel(n, ho, wo, c1, c2, c1_pad, pstr),
        out_shape=jax.ShapeDtypeStruct((c2, m), jnp.float32),
        scratch_shapes=[pltpu.VMEM((9 * c1, m), jnp.float32)],    # stacked taps
    )(patches.astype(_MXU_DTYPE),      # wrapper-side bf16 cast: halves patch DMA
      w13.astype(_MXU_DTYPE),
      w2m.astype(_MXU_DTYPE),
      bn)

    # (C2, M) -> NCHW: only a small leading-dims transpose remains in XLA.
    return jnp.transpose(out_cm.reshape(c2, n, ho, wo), (1, 0, 2, 3))


# ---------------------------------------------------------------------------
# Pure-JAX f32 reference (faithful to the PyTorch module, including conv biases)
# ---------------------------------------------------------------------------
def ref_forward(x, p):
    dn = ("NCHW", "OIHW", "NCHW")

    def conv(x, w, b, s, pad):
        y = jax.lax.conv_general_dilated(x, w, (s, s), [(pad, pad), (pad, pad)],
                                         dimension_numbers=dn)
        return y + b.reshape(1, -1, 1, 1)

    def bn(x, g, be):
        mean = jnp.mean(x, axis=(0, 2, 3), keepdims=True)
        var = jnp.mean((x - mean) ** 2, axis=(0, 2, 3), keepdims=True)
        return ((x - mean) * jax.lax.rsqrt(var + _BN_EPS) * g.reshape(1, -1, 1, 1)
                + be.reshape(1, -1, 1, 1))

    elu = lambda y: jnp.where(y > 0, y, jnp.exp(jnp.minimum(y, 0.0)) - 1.0)

    skip = conv(x, p["w3"], p["b3"], 2, 1)
    h = elu(bn(conv(x, p["w1"], p["b1"], 2, 1), p["g1"], p["be1"]))
    h = conv(h, p["w2"], p["b2"], 1, 1)
    return elu(bn(h + skip, p["g2"], p["be2"]))


# ---------------------------------------------------------------------------
if __name__ == "__main__":
    channel_in, channel_out, k = 4, 8, 3
    N, H, W = 2, 16, 16

    key = jax.random.PRNGKey(0)
    keys = jax.random.split(key, 11)

    # Deterministic synthetic parameters in PyTorch layouts (conv weights OIHW).
    params = {
        "w1": 0.1 * jax.random.normal(keys[0], (channel_out // 2, channel_in, k, k), jnp.float32),
        "b1": 0.1 * jax.random.normal(keys[1], (channel_out // 2,), jnp.float32),
        "w2": 0.1 * jax.random.normal(keys[2], (channel_out, channel_out // 2, k, k), jnp.float32),
        "b2": 0.1 * jax.random.normal(keys[3], (channel_out,), jnp.float32),
        "w3": 0.1 * jax.random.normal(keys[4], (channel_out, channel_in, k, k), jnp.float32),
        "b3": 0.1 * jax.random.normal(keys[5], (channel_out,), jnp.float32),
        "g1": 1.0 + 0.1 * jax.random.normal(keys[6], (channel_out // 2,), jnp.float32),
        "be1": 0.1 * jax.random.normal(keys[7], (channel_out // 2,), jnp.float32),
        "g2": 1.0 + 0.1 * jax.random.normal(keys[8], (channel_out,), jnp.float32),
        "be2": 0.1 * jax.random.normal(keys[9], (channel_out,), jnp.float32),
    }

    x = jax.random.normal(keys[10], (N, channel_in, H, W), jnp.float32)

    fwd = jax.jit(res_down_forward)
    out = jax.block_until_ready(fwd(x, params))

    ref = jax.block_until_ready(ref_forward(x, params))
    assert out.shape == (N, channel_out, H // 2, W // 2), out.shape
    # bf16 MXU feed (f32 accumulation) vs f32 reference -> tolerance loosened
    # from 1e-3 to 5e-2 per the perf review's "re-validate tolerances" note.
    err = float(np.max(np.abs(np.asarray(out) - np.asarray(ref))))
    assert np.allclose(np.asarray(out), np.asarray(ref), rtol=5e-2, atol=5e-2), err

    print("KERNEL_OK")
</pallas_src>

<mosaic_0001>
module attributes {stable_mosaic.version = 11 : i64} {
  func.func @kernel(%arg0: memref<36x128xbf16, #tpu.memory_space<vmem>>, %arg1: memref<16x36xbf16, #tpu.memory_space<vmem>>, %arg2: memref<8x36xbf16, #tpu.memory_space<vmem>>, %arg3: memref<32x1xf32, #tpu.memory_space<vmem>>, %arg4: memref<8x128xf32, #tpu.memory_space<vmem>>, %arg5: memref<36x128xf32, #tpu.memory_space<vmem>>) attributes {dimension_semantics = [], scalar_prefetch = 0 : i64, scratch_operands = 1 : i64, tpu.core_type = #tpu.core_type<tc>} {
    %c0 = arith.constant 0 : index
    %c0_0 = arith.constant 0 : index
    %0 = vector.load %arg1[%c0, %c0_0] : memref<16x36xbf16, #tpu.memory_space<vmem>>, vector<16x36xbf16>
    %c0_1 = arith.constant 0 : index
    %c0_2 = arith.constant 0 : index
    %1 = vector.load %arg0[%c0_1, %c0_2] : memref<36x128xbf16, #tpu.memory_space<vmem>>, vector<36x128xbf16>
    %cst = arith.constant dense<0.000000e+00> : vector<16x128xf32>
    %2 = tpu.matmul %0, %1, %cst {dimension_numbers = #tpu.dot_dimension_numbers<[1], [0], [0], [1], [0, 0, 1, 1], [], []>} : vector<16x36xbf16>, vector<36x128xbf16>, vector<16x128xf32> -> vector<16x128xf32>
    %3 = vector.extract_strided_slice %2 {offsets = [0, 0], sizes = [4, 128], strides = [1, 1]} : vector<16x128xf32> to vector<4x128xf32>
    %4 = vector.extract_strided_slice %2 {offsets = [8, 0], sizes = [8, 128], strides = [1, 1]} : vector<16x128xf32> to vector<8x128xf32>
    %c0_3 = arith.constant 0 : index
    %c0_4 = arith.constant 0 : index
    %5 = vector.load %arg3[%c0_3, %c0_4] : memref<32x1xf32, #tpu.memory_space<vmem>>, vector<4x1xf32>
    %c8 = arith.constant 8 : index
    %c0_5 = arith.constant 0 : index
    %6 = vector.load %arg3[%c8, %c0_5] : memref<32x1xf32, #tpu.memory_space<vmem>>, vector<4x1xf32>
    %cst_6 = arith.constant dense<0.000000e+00> : vector<4xf32>
    %7 = vector.multi_reduction <add>, %3, %cst_6 [1] : vector<4x128xf32> to vector<4xf32>
    %8 = vector.shape_cast %7 : vector<4xf32> to vector<4x1xf32>
    %9 = arith.mulf %3, %3 : vector<4x128xf32>
    %cst_7 = arith.constant dense<0.000000e+00> : vector<4xf32>
    %10 = vector.multi_reduction <add>, %9, %cst_7 [1] : vector<4x128xf32> to vector<4xf32>
    %11 = vector.shape_cast %10 : vector<4xf32> to vector<4x1xf32>
    %cst_8 = arith.constant 7.812500e-03 : f32
    %12 = vector.broadcast %cst_8 : f32 to vector<4x1xf32>
    %13 = arith.mulf %8, %12 : vector<4x1xf32>
    %cst_9 = arith.constant 7.812500e-03 : f32
    %14 = vector.broadcast %cst_9 : f32 to vector<4x1xf32>
    %15 = arith.mulf %11, %14 : vector<4x1xf32>
    %16 = arith.mulf %13, %13 : vector<4x1xf32>
    %17 = arith.subf %15, %16 : vector<4x1xf32>
    %cst_10 = arith.constant 0.000000e+00 : f32
    %18 = vector.broadcast %cst_10 : f32 to vector<4x1xf32>
    %19 = arith.maximumf %17, %18 : vector<4x1xf32>
    %20 = vector.broadcast %13 : vector<4x1xf32> to vector<4x128xf32>
    %21 = arith.subf %3, %20 : vector<4x128xf32>
    %cst_11 = arith.constant 9.99999974E-5 : f32
    %22 = vector.broadcast %cst_11 : f32 to vector<4x1xf32>
    %23 = arith.addf %19, %22 : vector<4x1xf32>
    %24 = math.rsqrt %23 : vector<4x1xf32>
    %25 = vector.broadcast %24 : vector<4x1xf32> to vector<4x128xf32>
    %26 = arith.mulf %21, %25 : vector<4x128xf32>
    %27 = vector.broadcast %5 : vector<4x1xf32> to vector<4x128xf32>
    %28 = arith.mulf %26, %27 : vector<4x128xf32>
    %29 = vector.broadcast %6 : vector<4x1xf32> to vector<4x128xf32>
    %30 = arith.addf %28, %29 : vector<4x128xf32>
    %cst_12 = arith.constant 0.000000e+00 : f32
    %31 = vector.broadcast %cst_12 : f32 to vector<4x128xf32>
    %32 = arith.cmpf ogt, %30, %31 : vector<4x128xf32>
    %cst_13 = arith.constant 0.000000e+00 : f32
    %33 = vector.broadcast %cst_13 : f32 to vector<4x128xf32>
    %34 = arith.minimumf %30, %33 : vector<4x128xf32>
    %35 = math.exp %34 : vector<4x128xf32>
    %cst_14 = arith.constant 1.000000e+00 : f32
    %36 = vector.broadcast %cst_14 : f32 to vector<4x128xf32>
    %37 = arith.subf %35, %36 : vector<4x128xf32>
    %38 = arith.select %32, %30, %37 : vector<4x128xi1>, vector<4x128xf32>
    %39 = tpu.iota {dimensions = array<i32: 1>} : vector<1x128xi32>
    %c7_i32 = arith.constant 7 : i32
    %40 = vector.broadcast %c7_i32 : i32 to vector<1x128xi32>
    %41 = arith.andi %39, %40 : vector<1x128xi32>
    %c3_i32 = arith.constant 3 : i32
    %42 = vector.broadcast %c3_i32 : i32 to vector<1x128xi32>
    %43 = arith.shrsi %39, %42 : vector<1x128xi32>
    %c7_i32_15 = arith.constant 7 : i32
    %44 = vector.broadcast %c7_i32_15 : i32 to vector<1x128xi32>
    %45 = arith.andi %43, %44 : vector<1x128xi32>
    %c9_i32 = arith.constant 9 : i32
    %46 = tpu.dynamic_rotate %38 by %c9_i32 dim 1 : vector<4x128xf32>, i32 -> vector<4x128xf32>
    %c-1_i32 = arith.constant -1 : i32
    %47 = vector.broadcast %c-1_i32 : i32 to vector<1x128xi32>
    %48 = arith.addi %45, %47 : vector<1x128xi32>
    %c0_i32 = arith.constant 0 : i32
    %49 = vector.broadcast %c0_i32 : i32 to vector<1x128xi32>
    %50 = arith.cmpi sge, %48, %49 : vector<1x128xi32>
    %c-1_i32_16 = arith.constant -1 : i32
    %51 = vector.broadcast %c-1_i32_16 : i32 to vector<1x128xi32>
    %52 = arith.addi %45, %51 : vector<1x128xi32>
    %c8_i32 = arith.constant 8 : i32
    %53 = vector.broadcast %c8_i32 : i32 to vector<1x128xi32>
    %54 = arith.cmpi slt, %52, %53 : vector<1x128xi32>
    %55 = arith.andi %50, %54 : vector<1x128xi1>
    %c-1_i32_17 = arith.constant -1 : i32
    %56 = vector.broadcast %c-1_i32_17 : i32 to vector<1x128xi32>
    %57 = arith.addi %41, %56 : vector<1x128xi32>
    %c0_i32_18 = arith.constant 0 : i32
    %58 = vector.broadcast %c0_i32_18 : i32 to vector<1x128xi32>
    %59 = arith.cmpi sge, %57, %58 : vector<1x128xi32>
    %60 = arith.andi %55, %59 : vector<1x128xi1>
    %c-1_i32_19 = arith.constant -1 : i32
    %61 = vector.broadcast %c-1_i32_19 : i32 to vector<1x128xi32>
    %62 = arith.addi %41, %61 : vector<1x128xi32>
    %c8_i32_20 = arith.constant 8 : i32
    %63 = vector.broadcast %c8_i32_20 : i32 to vector<1x128xi32>
    %64 = arith.cmpi slt, %62, %63 : vector<1x128xi32>
    %65 = arith.andi %60, %64 : vector<1x128xi1>
    %cst_21 = arith.constant 0.000000e+00 : f32
    %66 = vector.shape_cast %65 : vector<1x128xi1> to vector<1x128xi1>
    %67 = vector.broadcast %66 : vector<1x128xi1> to vector<4x128xi1>
    %68 = vector.broadcast %cst_21 : f32 to vector<4x128xf32>
    %69 = arith.select %67, %46, %68 : vector<4x128xi1>, vector<4x128xf32>
    %c0_22 = arith.constant 0 : index
    %c0_23 = arith.constant 0 : index
    %70 = vector.load %arg5[%c0_22, %c0_23] : memref<36x128xf32, #tpu.memory_space<vmem>>, vector<4x128xf32>
    tpu.vector_store %arg5[%c0_22, %c0_23], %69 {strides = array<i32>} : memref<36x128xf32, #tpu.memory_space<vmem>>, vector<4x128xf32>,
    %c8_i32_24 = arith.constant 8 : i32
    %71 = tpu.dynamic_rotate %38 by %c8_i32_24 dim 1 : vector<4x128xf32>, i32 -> vector<4x128xf32>
    %c-1_i32_25 = arith.constant -1 : i32
    %72 = vector.broadcast %c-1_i32_25 : i32 to vector<1x128xi32>
    %73 = arith.addi %45, %72 : vector<1x128xi32>
    %c0_i32_26 = arith.constant 0 : i32
    %74 = vector.broadcast %c0_i32_26 : i32 to vector<1x128xi32>
    %75 = arith.cmpi sge, %73, %74 : vector<1x128xi32>
    %c-1_i32_27 = arith.constant -1 : i32
    %76 = vector.broadcast %c-1_i32_27 : i32 to vector<1x128xi32>
    %77 = arith.addi %45, %76 : vector<1x128xi32>
    %c8_i32_28 = arith.constant 8 : i32
    %78 = vector.broadcast %c8_i32_28 : i32 to vector<1x128xi32>
    %79 = arith.cmpi slt, %77, %78 : vector<1x128xi32>
    %80 = arith.andi %75, %79 : vector<1x128xi1>
    %c0_i32_29 = arith.constant 0 : i32
    %81 = vector.broadcast %c0_i32_29 : i32 to vector<1x128xi32>
    %82 = arith.addi %41, %81 : vector<1x128xi32>
    %c0_i32_30 = arith.constant 0 : i32
    %83 = vector.broadcast %c0_i32_30 : i32 to vector<1x128xi32>
    %84 = arith.cmpi sge, %82, %83 : vector<1x128xi32>
    %85 = arith.andi %80, %84 : vector<1x128xi1>
    %c0_i32_31 = arith.constant 0 : i32
    %86 = vector.broadcast %c0_i32_31 : i32 to vector<1x128xi32>
    %87 = arith.addi %41, %86 : vector<1x128xi32>
    %c8_i32_32 = arith.constant 8 : i32
    %88 = vector.broadcast %c8_i32_32 : i32 to vector<1x128xi32>
    %89 = arith.cmpi slt, %87, %88 : vector<1x128xi32>
    %90 = arith.andi %85, %89 : vector<1x128xi1>
    %cst_33 = arith.constant 0.000000e+00 : f32
    %91 = vector.shape_cast %90 : vector<1x128xi1> to vector<1x128xi1>
    %92 = vector.broadcast %91 : vector<1x128xi1> to vector<4x128xi1>
    %93 = vector.broadcast %cst_33 : f32 to vector<4x128xf32>
    %94 = arith.select %92, %71, %93 : vector<4x128xi1>, vector<4x128xf32>
    %c4 = arith.constant 4 : index
    %c0_34 = arith.constant 0 : index
    %95 = vector.load %arg5[%c4, %c0_34] : memref<36x128xf32, #tpu.memory_space<vmem>>, vector<4x128xf32>
    tpu.vector_store %arg5[%c4, %c0_34], %94 {strides = array<i32>} : memref<36x128xf32, #tpu.memory_space<vmem>>, vector<4x128xf32>,
    %c7_i32_35 = arith.constant 7 : i32
    %96 = tpu.dynamic_rotate %38 by %c7_i32_35 dim 1 : vector<4x128xf32>, i32 -> vector<4x128xf32>
    %c-1_i32_36 = arith.constant -1 : i32
    %97 = vector.broadcast %c-1_i32_36 : i32 to vector<1x128xi32>
    %98 = arith.addi %45, %97 : vector<1x128xi32>
    %c0_i32_37 = arith.constant 0 : i32
    %99 = vector.broadcast %c0_i32_37 : i32 to vector<1x128xi32>
    %100 = arith.cmpi sge, %98, %99 : vector<1x128xi32>
    %c-1_i32_38 = arith.constant -1 : i32
    %101 = vector.broadcast %c-1_i32_38 : i32 to vector<1x128xi32>
    %102 = arith.addi %45, %101 : vector<1x128xi32>
    %c8_i32_39 = arith.constant 8 : i32
    %103 = vector.broadcast %c8_i32_39 : i32 to vector<1x128xi32>
    %104 = arith.cmpi slt, %102, %103 : vector<1x128xi32>
    %105 = arith.andi %100, %104 : vector<1x128xi1>
    %c1_i32 = arith.constant 1 : i32
    %106 = vector.broadcast %c1_i32 : i32 to vector<1x128xi32>
    %107 = arith.addi %41, %106 : vector<1x128xi32>
    %c0_i32_40 = arith.constant 0 : i32
    %108 = vector.broadcast %c0_i32_40 : i32 to vector<1x128xi32>
    %109 = arith.cmpi sge, %107, %108 : vector<1x128xi32>
    %110 = arith.andi %105, %109 : vector<1x128xi1>
    %c1_i32_41 = arith.constant 1 : i32
    %111 = vector.broadcast %c1_i32_41 : i32 to vector<1x128xi32>
    %112 = arith.addi %41, %111 : vector<1x128xi32>
    %c8_i32_42 = arith.constant 8 : i32
    %113 = vector.broadcast %c8_i32_42 : i32 to vector<1x128xi32>
    %114 = arith.cmpi slt, %112, %113 : vector<1x128xi32>
    %115 = arith.andi %110, %114 : vector<1x128xi1>
    %cst_43 = arith.constant 0.000000e+00 : f32
    %116 = vector.shape_cast %115 : vector<1x128xi1> to vector<1x128xi1>
    %117 = vector.broadcast %116 : vector<1x128xi1> to vector<4x128xi1>
    %118 = vector.broadcast %cst_43 : f32 to vector<4x128xf32>
    %119 = arith.select %117, %96, %118 : vector<4x128xi1>, vector<4x128xf32>
    %c8_44 = arith.constant 8 : index
    %c0_45 = arith.constant 0 : index
    %120 = vector.load %arg5[%c8_44, %c0_45] : memref<36x128xf32, #tpu.memory_space<vmem>>, vector<4x128xf32>
    tpu.vector_store %arg5[%c8_44, %c0_45], %119 {strides = array<i32>} : memref<36x128xf32, #tpu.memory_space<vmem>>, vector<4x128xf32>,
    %c1_i32_46 = arith.constant 1 : i32
    %121 = tpu.dynamic_rotate %38 by %c1_i32_46 dim 1 : vector<4x128xf32>, i32 -> vector<4x128xf32>
    %c0_i32_47 = arith.constant 0 : i32
    %122 = vector.broadcast %c0_i32_47 : i32 to vector<1x128xi32>
    %123 = arith.addi %45, %122 : vector<1x128xi32>
    %c0_i32_48 = arith.constant 0 : i32
    %124 = vector.broadcast %c0_i32_48 : i32 to vector<1x128xi32>
    %125 = arith.cmpi sge, %123, %124 : vector<1x128xi32>
    %c0_i32_49 = arith.constant 0 : i32
    %126 = vector.broadcast %c0_i32_49 : i32 to vector<1x128xi32>
    %127 = arith.addi %45, %126 : vector<1x128xi32>
    %c8_i32_50 = arith.constant 8 : i32
    %128 = vector.broadcast %c8_i32_50 : i32 to vector<1x128xi32>
    %129 = arith.cmpi slt, %127, %128 : vector<1x128xi32>
    %130 = arith.andi %125, %129 : vector<1x128xi1>
    %c-1_i32_51 = arith.constant -1 : i32
    %131 = vector.broadcast %c-1_i32_51 : i32 to vector<1x128xi32>
    %132 = arith.addi %41, %131 : vector<1x128xi32>
    %c0_i32_52 = arith.constant 0 : i32
    %133 = vector.broadcast %c0_i32_52 : i32 to vector<1x128xi32>
    %134 = arith.cmpi sge, %132, %133 : vector<1x128xi32>
    %135 = arith.andi %130, %134 : vector<1x128xi1>
    %c-1_i32_53 = arith.constant -1 : i32
    %136 = vector.broadcast %c-1_i32_53 : i32 to vector<1x128xi32>
    %137 = arith.addi %41, %136 : vector<1x128xi32>
    %c8_i32_54 = arith.constant 8 : i32
    %138 = vector.broadcast %c8_i32_54 : i32 to vector<1x128xi32>
    %139 = arith.cmpi slt, %137, %138 : vector<1x128xi32>
    %140 = arith.andi %135, %139 : vector<1x128xi1>
    %cst_55 = arith.constant 0.000000e+00 : f32
    %141 = vector.shape_cast %140 : vector<1x128xi1> to vector<1x128xi1>
    %142 = vector.broadcast %141 : vector<1x128xi1> to vector<4x128xi1>
    %143 = vector.broadcast %cst_55 : f32 to vector<4x128xf32>
    %144 = arith.select %142, %121, %143 : vector<4x128xi1>, vector<4x128xf32>
    %c12 = arith.constant 12 : index
    %c0_56 = arith.constant 0 : index
    %145 = vector.load %arg5[%c12, %c0_56] : memref<36x128xf32, #tpu.memory_space<vmem>>, vector<4x128xf32>
    tpu.vector_store %arg5[%c12, %c0_56], %144 {strides = array<i32>} : memref<36x128xf32, #tpu.memory_space<vmem>>, vector<4x128xf32>,
    %c0_i32_57 = arith.constant 0 : i32
    %146 = vector.broadcast %c0_i32_57 : i32 to vector<1x128xi32>
    %147 = arith.addi %45, %146 : vector<1x128xi32>
    %c0_i32_58 = arith.constant 0 : i32
    %148 = vector.broadcast %c0_i32_58 : i32 to vector<1x128xi32>
    %149 = arith.cmpi sge, %147, %148 : vector<1x128xi32>
    %c0_i32_59 = arith.constant 0 : i32
    %150 = vector.broadcast %c0_i32_59 : i32 to vector<1x128xi32>
    %151 = arith.addi %45, %150 : vector<1x128xi32>
    %c8_i32_60 = arith.constant 8 : i32
    %152 = vector.broadcast %c8_i32_60 : i32 to vector<1x128xi32>
    %153 = arith.cmpi slt, %151, %152 : vector<1x128xi32>
    %154 = arith.andi %149, %153 : vector<1x128xi1>
    %c0_i32_61 = arith.constant 0 : i32
    %155 = vector.broadcast %c0_i32_61 : i32 to vector<1x128xi32>
    %156 = arith.addi %41, %155 : vector<1x128xi32>
    %c0_i32_62 = arith.constant 0 : i32
    %157 = vector.broadcast %c0_i32_62 : i32 to vector<1x128xi32>
    %158 = arith.cmpi sge, %156, %157 : vector<1x128xi32>
    %159 = arith.andi %154, %158 : vector<1x128xi1>
    %c0_i32_63 = arith.constant 0 : i32
    %160 = vector.broadcast %c0_i32_63 : i32 to vector<1x128xi32>
    %161 = arith.addi %41, %160 : vector<1x128xi32>
    %c8_i32_64 = arith.constant 8 : i32
    %162 = vector.broadcast %c8_i32_64 : i32 to vector<1x128xi32>
    %163 = arith.cmpi slt, %161, %162 : vector<1x128xi32>
    %164 = arith.andi %159, %163 : vector<1x128xi1>
    %cst_65 = arith.constant 0.000000e+00 : f32
    %165 = vector.shape_cast %164 : vector<1x128xi1> to vector<1x128xi1>
    %166 = vector.broadcast %165 : vector<1x128xi1> to vector<4x128xi1>
    %167 = vector.broadcast %cst_65 : f32 to vector<4x128xf32>
    %168 = arith.select %166, %38, %167 : vector<4x128xi1>, vector<4x128xf32>
    %c16 = arith.constant 16 : index
    %c0_66 = arith.constant 0 : index
    %169 = vector.load %arg5[%c16, %c0_66] : memref<36x128xf32, #tpu.memory_space<vmem>>, vector<4x128xf32>
    tpu.vector_store %arg5[%c16, %c0_66], %168 {strides = array<i32>} : memref<36x128xf32, #tpu.memory_space<vmem>>, vector<4x128xf32>,
    %c127_i32 = arith.constant 127 : i32
    %170 = tpu.dynamic_rotate %38 by %c127_i32 dim 1 : vector<4x128xf32>, i32 -> vector<4x128xf32>
    %c0_i32_67 = arith.constant 0 : i32
    %171 = vector.broadcast %c0_i32_67 : i32 to vector<1x128xi32>
    %172 = arith.addi %45, %171 : vector<1x128xi32>
    %c0_i32_68 = arith.constant 0 : i32
    %173 = vector.broadcast %c0_i32_68 : i32 to vector<1x128xi32>
    %174 = arith.cmpi sge, %172, %173 : vector<1x128xi32>
    %c0_i32_69 = arith.constant 0 : i32
    %175 = vector.broadcast %c0_i32_69 : i32 to vector<1x128xi32>
    %176 = arith.addi %45, %175 : vector<1x128xi32>
    %c8_i32_70 = arith.constant 8 : i32
    %177 = vector.broadcast %c8_i32_70 : i32 to vector<1x128xi32>
    %178 = arith.cmpi slt, %176, %177 : vector<1x128xi32>
    %179 = arith.andi %174, %178 : vector<1x128xi1>
    %c1_i32_71 = arith.constant 1 : i32
    %180 = vector.broadcast %c1_i32_71 : i32 to vector<1x128xi32>
    %181 = arith.addi %41, %180 : vector<1x128xi32>
    %c0_i32_72 = arith.constant 0 : i32
    %182 = vector.broadcast %c0_i32_72 : i32 to vector<1x128xi32>
    %183 = arith.cmpi sge, %181, %182 : vector<1x128xi32>
    %184 = arith.andi %179, %183 : vector<1x128xi1>
    %c1_i32_73 = arith.constant 1 : i32
    %185 = vector.broadcast %c1_i32_73 : i32 to vector<1x128xi32>
    %186 = arith.addi %41, %185 : vector<1x128xi32>
    %c8_i32_74 = arith.constant 8 : i32
    %187 = vector.broadcast %c8_i32_74 : i32 to vector<1x128xi32>
    %188 = arith.cmpi slt, %186, %187 : vector<1x128xi32>
    %189 = arith.andi %184, %188 : vector<1x128xi1>
    %cst_75 = arith.constant 0.000000e+00 : f32
    %190 = vector.shape_cast %189 : vector<1x128xi1> to vector<1x128xi1>
    %191 = vector.broadcast %190 : vector<1x128xi1> to vector<4x128xi1>
    %192 = vector.broadcast %cst_75 : f32 to vector<4x128xf32>
    %193 = arith.select %191, %170, %192 : vector<4x128xi1>, vector<4x128xf32>
    %c20 = arith.constant 20 : index
    %c0_76 = arith.constant 0 : index
    %194 = vector.load %arg5[%c20, %c0_76] : memref<36x128xf32, #tpu.memory_space<vmem>>, vector<4x128xf32>
    tpu.vector_store %arg5[%c20, %c0_76], %193 {strides = array<i32>} : memref<36x128xf32, #tpu.memory_space<vmem>>, vector<4x128xf32>,
    %c121_i32 = arith.constant 121 : i32
    %195 = tpu.dynamic_rotate %38 by %c121_i32 dim 1 : vector<4x128xf32>, i32 -> vector<4x128xf32>
    %c1_i32_77 = arith.constant 1 : i32
    %196 = vector.broadcast %c1_i32_77 : i32 to vector<1x128xi32>
    %197 = arith.addi %45, %196 : vector<1x128xi32>
    %c0_i32_78 = arith.constant 0 : i32
    %198 = vector.broadcast %c0_i32_78 : i32 to vector<1x128xi32>
    %199 = arith.cmpi sge, %197, %198 : vector<1x128xi32>
    %c1_i32_79 = arith.constant 1 : i32
    %200 = vector.broadcast %c1_i32_79 : i32 to vector<1x128xi32>
    %201 = arith.addi %45, %200 : vector<1x128xi32>
    %c8_i32_80 = arith.constant 8 : i32
    %202 = vector.broadcast %c8_i32_80 : i32 to vector<1x128xi32>
    %203 = arith.cmpi slt, %201, %202 : vector<1x128xi32>
    %204 = arith.andi %199, %203 : vector<1x128xi1>
    %c-1_i32_81 = arith.constant -1 : i32
    %205 = vector.broadcast %c-1_i32_81 : i32 to vector<1x128xi32>
    %206 = arith.addi %41, %205 : vector<1x128xi32>
    %c0_i32_82 = arith.constant 0 : i32
    %207 = vector.broadcast %c0_i32_82 : i32 to vector<1x128xi32>
    %208 = arith.cmpi sge, %206, %207 : vector<1x128xi32>
    %209 = arith.andi %204, %208 : vector<1x128xi1>
    %c-1_i32_83 = arith.constant -1 : i32
    %210 = vector.broadcast %c-1_i32_83 : i32 to vector<1x128xi32>
    %211 = arith.addi %41, %210 : vector<1x128xi32>
    %c8_i32_84 = arith.constant 8 : i32
    %212 = vector.broadcast %c8_i32_84 : i32 to vector<1x128xi32>
    %213 = arith.cmpi slt, %211, %212 : vector<1x128xi32>
    %214 = arith.andi %209, %213 : vector<1x128xi1>
    %cst_85 = arith.constant 0.000000e+00 : f32
    %215 = vector.shape_cast %214 : vector<1x128xi1> to vector<1x128xi1>
    %216 = vector.broadcast %215 : vector<1x128xi1> to vector<4x128xi1>
    %217 = vector.broadcast %cst_85 : f32 to vector<4x128xf32>
    %218 = arith.select %216, %195, %217 : vector<4x128xi1>, vector<4x128xf32>
    %c24 = arith.constant 24 : index
    %c0_86 = arith.constant 0 : index
    %219 = vector.load %arg5[%c24, %c0_86] : memref<36x128xf32, #tpu.memory_space<vmem>>, vector<4x128xf32>
    tpu.vector_store %arg5[%c24, %c0_86], %218 {strides = array<i32>} : memref<36x128xf32, #tpu.memory_space<vmem>>, vector<4x128xf32>,
    %c120_i32 = arith.constant 120 : i32
    %220 = tpu.dynamic_rotate %38 by %c120_i32 dim 1 : vector<4x128xf32>, i32 -> vector<4x128xf32>
    %c1_i32_87 = arith.constant 1 : i32
    %221 = vector.broadcast %c1_i32_87 : i32 to vector<1x128xi32>
    %222 = arith.addi %45, %221 : vector<1x128xi32>
    %c0_i32_88 = arith.constant 0 : i32
    %223 = vector.broadcast %c0_i32_88 : i32 to vector<1x128xi32>
    %224 = arith.cmpi sge, %222, %223 : vector<1x128xi32>
    %c1_i32_89 = arith.constant 1 : i32
    %225 = vector.broadcast %c1_i32_89 : i32 to vector<1x128xi32>
    %226 = arith.addi %45, %225 : vector<1x128xi32>
    %c8_i32_90 = arith.constant 8 : i32
    %227 = vector.broadcast %c8_i32_90 : i32 to vector<1x128xi32>
    %228 = arith.cmpi slt, %226, %227 : vector<1x128xi32>
    %229 = arith.andi %224, %228 : vector<1x128xi1>
    %c0_i32_91 = arith.constant 0 : i32
    %230 = vector.broadcast %c0_i32_91 : i32 to vector<1x128xi32>
    %231 = arith.addi %41, %230 : vector<1x128xi32>
    %c0_i32_92 = arith.constant 0 : i32
    %232 = vector.broadcast %c0_i32_92 : i32 to vector<1x128xi32>
    %233 = arith.cmpi sge, %231, %232 : vector<1x128xi32>
    %234 = arith.andi %229, %233 : vector<1x128xi1>
    %c0_i32_93 = arith.constant 0 : i32
    %235 = vector.broadcast %c0_i32_93 : i32 to vector<1x128xi32>
    %236 = arith.addi %41, %235 : vector<1x128xi32>
    %c8_i32_94 = arith.constant 8 : i32
    %237 = vector.broadcast %c8_i32_94 : i32 to vector<1x128xi32>
    %238 = arith.cmpi slt, %236, %237 : vector<1x128xi32>
    %239 = arith.andi %234, %238 : vector<1x128xi1>
    %cst_95 = arith.constant 0.000000e+00 : f32
    %240 = vector.shape_cast %239 : vector<1x128xi1> to vector<1x128xi1>
    %241 = vector.broadcast %240 : vector<1x128xi1> to vector<4x128xi1>
    %242 = vector.broadcast %cst_95 : f32 to vector<4x128xf32>
    %243 = arith.select %241, %220, %242 : vector<4x128xi1>, vector<4x128xf32>
    %c28 = arith.constant 28 : index
    %c0_96 = arith.constant 0 : index
    %244 = vector.load %arg5[%c28, %c0_96] : memref<36x128xf32, #tpu.memory_space<vmem>>, vector<4x128xf32>
    tpu.vector_store %arg5[%c28, %c0_96], %243 {strides = array<i32>} : memref<36x128xf32, #tpu.memory_space<vmem>>, vector<4x128xf32>,
    %c119_i32 = arith.constant 119 : i32
    %245 = tpu.dynamic_rotate %38 by %c119_i32 dim 1 : vector<4x128xf32>, i32 -> vector<4x128xf32>
    %c1_i32_97 = arith.constant 1 : i32
    %246 = vector.broadcast %c1_i32_97 : i32 to vector<1x128xi32>
    %247 = arith.addi %45, %246 : vector<1x128xi32>
    %c0_i32_98 = arith.constant 0 : i32
    %248 = vector.broadcast %c0_i32_98 : i32 to vector<1x128xi32>
    %249 = arith.cmpi sge, %247, %248 : vector<1x128xi32>
    %c1_i32_99 = arith.constant 1 : i32
    %250 = vector.broadcast %c1_i32_99 : i32 to vector<1x128xi32>
    %251 = arith.addi %45, %250 : vector<1x128xi32>
    %c8_i32_100 = arith.constant 8 : i32
    %252 = vector.broadcast %c8_i32_100 : i32 to vector<1x128xi32>
    %253 = arith.cmpi slt, %251, %252 : vector<1x128xi32>
    %254 = arith.andi %249, %253 : vector<1x128xi1>
    %c1_i32_101 = arith.constant 1 : i32
    %255 = vector.broadcast %c1_i32_101 : i32 to vector<1x128xi32>
    %256 = arith.addi %41, %255 : vector<1x128xi32>
    %c0_i32_102 = arith.constant 0 : i32
    %257 = vector.broadcast %c0_i32_102 : i32 to vector<1x128xi32>
    %258 = arith.cmpi sge, %256, %257 : vector<1x128xi32>
    %259 = arith.andi %254, %258 : vector<1x128xi1>
    %c1_i32_103 = arith.constant 1 : i32
    %260 = vector.broadcast %c1_i32_103 : i32 to vector<1x128xi32>
    %261 = arith.addi %41, %260 : vector<1x128xi32>
    %c8_i32_104 = arith.constant 8 : i32
    %262 = vector.broadcast %c8_i32_104 : i32 to vector<1x128xi32>
    %263 = arith.cmpi slt, %261, %262 : vector<1x128xi32>
    %264 = arith.andi %259, %263 : vector<1x128xi1>
    %cst_105 = arith.constant 0.000000e+00 : f32
    %265 = vector.shape_cast %264 : vector<1x128xi1> to vector<1x128xi1>
    %266 = vector.broadcast %265 : vector<1x128xi1> to vector<4x128xi1>
    %267 = vector.broadcast %cst_105 : f32 to vector<4x128xf32>
    %268 = arith.select %266, %245, %267 : vector<4x128xi1>, vector<4x128xf32>
    %c32 = arith.constant 32 : index
    %c0_106 = arith.constant 0 : index
    %269 = vector.load %arg5[%c32, %c0_106] : memref<36x128xf32, #tpu.memory_space<vmem>>, vector<4x128xf32>
    tpu.vector_store %arg5[%c32, %c0_106], %268 {strides = array<i32>} : memref<36x128xf32, #tpu.memory_space<vmem>>, vector<4x128xf32>,
    %c0_107 = arith.constant 0 : index
    %c0_108 = arith.constant 0 : index
    %270 = vector.load %arg2[%c0_107, %c0_108] : memref<8x36xbf16, #tpu.memory_space<vmem>>, vector<8x36xbf16>
    %c0_109 = arith.constant 0 : index
    %c0_110 = arith.constant 0 : index
    %271 = vector.load %arg5[%c0_109, %c0_110] : memref<36x128xf32, #tpu.memory_space<vmem>>, vector<36x128xf32>
    %272 = arith.truncf %271 : vector<36x128xf32> to vector<36x128xbf16>
    %cst_111 = arith.constant dense<0.000000e+00> : vector<8x128xf32>
    %273 = tpu.matmul %270, %272, %cst_111 {dimension_numbers = #tpu.dot_dimension_numbers<[1], [0], [0], [1], [0, 0, 1, 1], [], []>} : vector<8x36xbf16>, vector<36x128xbf16>, vector<8x128xf32> -> vector<8x128xf32>
    %274 = arith.addf %4, %273 : vector<8x128xf32>
    %c16_112 = arith.constant 16 : index
    %c0_113 = arith.constant 0 : index
    %275 = vector.load %arg3[%c16_112, %c0_113] : memref<32x1xf32, #tpu.memory_space<vmem>>, vector<8x1xf32>
    %c24_114 = arith.constant 24 : index
    %c0_115 = arith.constant 0 : index
    %276 = vector.load %arg3[%c24_114, %c0_115] : memref<32x1xf32, #tpu.memory_space<vmem>>, vector<8x1xf32>
    %cst_116 = arith.constant dense<0.000000e+00> : vector<8xf32>
    %277 = vector.multi_reduction <add>, %274, %cst_116 [1] : vector<8x128xf32> to vector<8xf32>
    %278 = vector.shape_cast %277 : vector<8xf32> to vector<8x1xf32>
    %279 = arith.mulf %274, %274 : vector<8x128xf32>
    %cst_117 = arith.constant dense<0.000000e+00> : vector<8xf32>
    %280 = vector.multi_reduction <add>, %279, %cst_117 [1] : vector<8x128xf32> to vector<8xf32>
    %281 = vector.shape_cast %280 : vector<8xf32> to vector<8x1xf32>
    %cst_118 = arith.constant 7.812500e-03 : f32
    %282 = vector.broadcast %cst_118 : f32 to vector<8x1xf32>
    %283 = arith.mulf %278, %282 : vector<8x1xf32>
    %cst_119 = arith.constant 7.812500e-03 : f32
    %284 = vector.broadcast %cst_119 : f32 to vector<8x1xf32>
    %285 = arith.mulf %281, %284 : vector<8x1xf32>
    %286 = arith.mulf %283, %283 : vector<8x1xf32>
    %287 = arith.subf %285, %286 : vector<8x1xf32>
    %cst_120 = arith.constant 0.000000e+00 : f32
    %288 = vector.broadcast %cst_120 : f32 to vector<8x1xf32>
    %289 = arith.maximumf %287, %288 : vector<8x1xf32>
    %290 = vector.broadcast %283 : vector<8x1xf32> to vector<8x128xf32>
    %291 = arith.subf %274, %290 : vector<8x128xf32>
    %cst_121 = arith.constant 9.99999974E-5 : f32
    %292 = vector.broadcast %cst_121 : f32 to vector<8x1xf32>
    %293 = arith.addf %289, %292 : vector<8x1xf32>
    %294 = math.rsqrt %293 : vector<8x1xf32>
    %295 = vector.broadcast %294 : vector<8x1xf32> to vector<8x128xf32>
    %296 = arith.mulf %291, %295 : vector<8x128xf32>
    %297 = vector.broadcast %275 : vector<8x1xf32> to vector<8x128xf32>
    %298 = arith.mulf %296, %297 : vector<8x128xf32>
    %299 = vector.broadcast %276 : vector<8x1xf32> to vector<8x128xf32>
    %300 = arith.addf %298, %299 : vector<8x128xf32>
    %cst_122 = arith.constant 0.000000e+00 : f32
    %301 = vector.broadcast %cst_122 : f32 to vector<8x128xf32>
    %302 = arith.cmpf ogt, %300, %301 : vector<8x128xf32>
    %cst_123 = arith.constant 0.000000e+00 : f32
    %303 = vector.broadcast %cst_123 : f32 to vector<8x128xf32>
    %304 = arith.minimumf %300, %303 : vector<8x128xf32>
    %305 = math.exp %304 : vector<8x128xf32>
    %cst_124 = arith.constant 1.000000e+00 : f32
    %306 = vector.broadcast %cst_124 : f32 to vector<8x128xf32>
    %307 = arith.subf %305, %306 : vector<8x128xf32>
    %308 = arith.select %302, %300, %307 : vector<8x128xi1>, vector<8x128xf32>
    %c0_125 = arith.constant 0 : index
    %c0_126 = arith.constant 0 : index
    %309 = vector.load %arg4[%c0_125, %c0_126] : memref<8x128xf32, #tpu.memory_space<vmem>>, vector<8x128xf32>
    tpu.vector_store %arg4[%c0_125, %c0_126], %308 {strides = array<i32>} : memref<8x128xf32, #tpu.memory_space<vmem>>, vector<8x128xf32>,
    return
  }
}

</mosaic_0001>

<bundles_post_ra>
// kernel: res_down_forward.1
= control target key start
LH: loop header
LB: loop body
LE: loop exit
PB: predicated region body
PF: predicated region fallthrough
CT: control target
= control target key end

     0   :  { %vm49_vm0 = vcmask 1041408   ;;  %vm45_vm1 = vcmask 293888   ;;  %v322_v8 = vmov 0   ;;  %vm69_vm2 = vcmask 1043456   ;;  %s325_s27 = smov 119   ;;  %s326_s28 = smov 8   ;;  %s426_s0 = inlined_call_operand.vmem [shape: bf16[36,128], index: 0, kind: input, shape index: {}]   ;;  %s427_s1 = inlined_call_operand.vmem [shape: bf16[16,36], index: 1, kind: input, shape index: {}]   ;;  %s428_s3 = inlined_call_operand.vmem [shape: f32[32,1], index: 3, kind: input, shape index: {}]   ;;  %s429_s2 = inlined_call_operand.vmem [shape: bf16[8,36], index: 2, kind: input, shape index: {}]   ;;  %s430_s4 = inlined_call_operand.vmem [shape: f32[8,128], index: 4, kind: output, shape index: {}]  }
   0x1   :  { %v24_v0 = vld [vmem:[%s426_s0 + $0x10] sm:$0x3]  ;;  %v302_v4 = vld [vmem:[%s426_s0 + $0x8] sm:$0xff]  ;;  %v301_v5 = vld [vmem:[%s426_s0] sm:$0xff]  ;;  %312 = vset.pattern.permute.xlu1 %v322_v8  ;;  %313 = vset.pattern.permute.xlu0 %v322_v8  ;;  %v113_v30 = vlaneseq  ;;  %s323_s0 = smov 120   ;;  %s327_s29 = smov 127  }
   0x2   :  { %v39_v1 = vunpack.c.l.b16 %v24_v0  ;;  %v300_v6 = vld [vmem:[%s427_s1] sm:$0xff]  ;;  %v68_v9 = vld [vmem:[%s428_s3 + $0x8] sm:$0xf]  ;;  %s324_s1 = smov 121   ;;  %s328_s30 = smov 1   ;;  %v236_v46 = vld [vmem:[%s428_s3 + $0x10] sm:$0xff] }
   0x3   :  { %v67_v7 = vld [vmem:[%s428_s3] sm:$0xf]  ;;  %v114_v34 = vand.u32 127, %v113_v30  ;;  %s329_s5 = smov 9   ;;  %s330_s8 = smov 7   ;;  %v237_v47 = vld [vmem:[%s428_s3 + $0x18] sm:$0xff] }
   0x4   :  { %v42_v2 = vpack.c.b16 %v39_v1, %v39_v1  ;;  %97 = vperm.xlu1 %312, %v67_v7  }
   0x5   :  { %v116_v38 = vshra.s32 %v114_v34, 3  ;;  %v115_v48 = vand.u32 7, %v114_v34 }
   0x6   :  { %v51_v3 = vsel %vm49_vm0, %v42_v2, 0 }
   0x7   :  { %58 = vmatpush.bf16.msra.mxu0 %v51_v3  ;;  %v117_v40 = vand.u32 7, %v116_v38  ;;  %v145_v50 = vadd.s32 1, %v115_v48  ;;  %v124_v55 = vadd.s32 4294967295, %v115_v48 }
   0x9   :  { %vm156_vm6 = vcmp.ge.s32.totalorder %v117_v40, 0  ;;  %vm157_vm7 = vcmp.lt.s32.totalorder %v117_v40, 8  ;;  %v181_v49 = vadd.s32 1, %v117_v40  ;;  %vm148_vm12 = vcmp.lt.s32.totalorder %v145_v50, 8 }
   0xa   :  { %vm376_vm8 = vmand %vm156_vm6, %vm157_vm7  ;;  %v120_v54 = vadd.s32 4294967295, %v117_v40 }
   0xb   :  { %59 = vmatpush.bf16.msra.mxu0 %v302_v4  ;;  %vm182_vm10 = vcmp.ge.s32.totalorder %v181_v49, 0  ;;  %vm183_vm11 = vcmp.lt.s32.totalorder %v181_v49, 8  ;;  %vm174_vm15 = vmand %vm376_vm8, %vm148_vm12 }
   0xc   :  { %103 = vperm.xlu1 %312, %v68_v9   ;;  %vm388_vm13 = vmand %vm182_vm10, %vm183_vm11 }
   0xd   :  { %vm202_vm14 = vmand %vm388_vm13, %vm148_vm12 }
   0xf   :  { %60 = vmatpush.bf16.msra.mxu0 %v301_v5 }
  0x12   :  { %296 = vmatmul.msk.bf16.vlgmr.msra.gmra.mxu0 %vm45_vm1, %v300_v6 }
  0x76   :  { %v98_v25 = vpop.permute.xlu1 %97 }
  0x7e   :  { %v104_v35 = vpop.permute.xlu1 %103 }
  0x8f   :  { %v62_v10 = vpop.f32.mrf.mxu0 }
  0x90   :  { %v70_v11 = vsel %vm69_vm2, %v62_v10, 0.0  ;;  %v73_v12 = vmul.f32 %v62_v10, %v62_v10 }
  0x91   :  { %71 = vadd.xlane.f32.xlu0 %v70_v11 }
  0x92   :  { %v74_v13 = vsel %vm69_vm2, %v73_v12, 0.0  ;;  %vm121_vm2 = vcmp.ge.s32.totalorder %v120_v54, 0 }
  0x99   :  { %75 = vadd.xlane.f32.xlu0 %v74_v13 }
 0x104   :  { %v72_v14 = vpop.xlane.xlu0 %71 }
 0x105   :  { %v77_v15 = vmul.f32 0.0078125, %v72_v14 }
 0x107   :  { %v79_v17 = vmul.f32 %v77_v15, %v77_v15  ;;  %v82_v29 = vsub.f32 %v62_v10, %v77_v15 }
 0x10c   :  { %v76_v16 = vpop.xlane.xlu0 %75 }
 0x10d   :  { %v78_v18 = vmul.f32 0.0078125, %v76_v16  ;;  %v207_v16 = vld [vmem:[%s429_s2] sm:$0xf] }
 0x10f   :  { %v80_v19 = vsub.f32 %v78_v18, %v79_v17  ;;  %v64_v17 = vpop.f32.mrf.mxu0 }
 0x111   :  { %v81_v20 = vmax.f32 %v80_v19, 0.0 }
 0x113   :  { %v83_v21 = vadd.f32 0.0001, %v81_v20 }
 0x115   :  { %314 = vrsqrt.f32 %v83_v21  ;;  %vm90_vm4 = vweird.f32 %v83_v21 }
 0x11b   :  { %v315_v22 = vpop.eup %314 }
 0x11c   :  { %v85_v23 = vmul.f32 %v315_v22, %v83_v21  ;;  %vm91_vm3 = vweird.f32 %v315_v22 }
 0x11d   :  { %vm92_vm5 = vmor %vm90_vm4, %vm91_vm3  ;;  %vm122_vm3 = vcmp.lt.s32.totalorder %v120_v54, 8 }
 0x11e   :  { %v86_v24 = vmul.f32 %v315_v22, %v85_v23  ;;  %vm398_vm4 = vmand %vm121_vm2, %vm122_vm3 }
 0x120   :  { %v87_v26 = vmul.f32 0.5, %v86_v24 }
 0x122   :  { %v88_v27 = vsub.f32 1.5, %v87_v26 }
 0x124   :  { %v89_v28 = vmul.f32 %v315_v22, %v88_v27 }
 0x126   :  { %v93_v31 = vsel %vm92_vm5, %v315_v22, %v89_v28  ;;  %vm125_vm5 = vcmp.ge.s32.totalorder %v124_v55, 0 }
 0x127   :  { %v94_v32 = vmul.f32 %v93_v31, %v82_v29  ;;  %vm126_vm6 = vmand %vm398_vm4, %vm125_vm5 }
 0x128   :  { %vm185_vm7 = vmand %vm388_vm13, %vm125_vm5 }
 0x129   :  { %v100_v33 = vmul.f32 %v98_v25, %v94_v32 }
 0x12b   :  { %v106_v36 = vadd.f32 %v104_v35, %v100_v33 }
 0x12d   :  { %v108_v37 = vmin.f32 %v106_v36, 0.0  ;;  %vm107_vm9 = vcmp.gt.f32.partialorder %v106_v36, 0.0 }
 0x12f   :  { %v109_v39 = vmul.f32 1.442695, %v108_v37 }
 0x131   :  { %316 = vpow2.f32 %v109_v39 }
 0x137   :  { %v317_v41 = vpop.eup %316 }
 0x138   :  { %v297_v42 = vadd.f32 -1.0, %v317_v41 }
 0x13a   :  { %v112_v44 = vsel %vm107_vm9, %v106_v36, %v297_v42  ;;  %vm149_vm9 = vmand %vm398_vm4, %vm148_vm12 }
 0x13b   :  { %191 = vrot.lane.b32.xlu1 %v112_v44, %s323_s0  ;;  %179 = vrot.lane.b32.xlu0 %v112_v44, %s324_s1  ;;  %v169_v45 = vsel %vm376_vm8, %v112_v44, 0.0 }
 0x13c   :  { %199 = vrot.lane.b32.xlu2 %v112_v44, %s325_s27  ;;  %170 = vst [vmem:[#allocation2 + $0x10] sm:$0xf] %v169_v45 }
 0x143   :  { %133 = vrot.lane.b32.xlu1 %v112_v44, %s326_s28 }
 0x144   :  { %171 = vrot.lane.b32.xlu2 %v112_v44, %s327_s29 }
 0x14b   :  { %154 = vrot.lane.b32.xlu1 %v112_v44, %s328_s30 }
 0x14c   :  { %118 = vrot.lane.b32.xlu2 %v112_v44, %s329_s5 }
 0x153   :  { %263 = vperm.xlu1 %312, %v236_v46  }
 0x154   :  { %143 = vrot.lane.b32.xlu2 %v112_v44, %s330_s8 }
 0x15b   :  { %269 = vperm.xlu1 %312, %v237_v47  }
 0x196   :  { %v200_v52 = vpop.permute.xlu2 %199 }
 0x197   :  { %v205_v53 = vsel %vm202_vm14, %v200_v52, 0.0 }
 0x198   :  { %206 = vst [vmem:[#allocation2 + $0x20] sm:$0xf] %v205_v53 }
 0x19e   :  { %v172_v56 = vpop.permute.xlu2 %171 }
 0x19f   :  { %v177_v57 = vsel %vm174_vm15, %v172_v56, 0.0  ;;  %v212_v58 = vld [vmem:[#allocation2 + $0x20] sm:$0xf] }
 0x1a0   :  { %178 = vst [vmem:[#allocation2 + $0x14] sm:$0xf] %v177_v57  ;;  %v215_v59 = vpack.c.bf16 %v212_v58, %v212_v58 }
 0x1a2   :  { %v220_v61 = vsel %vm49_vm0, %v215_v59, 0  ;;  %vm159_vm0 = vmand %vm376_vm8, %vm125_vm5 }
 0x1a3   :  { %227 = vmatpush.bf16.msra.mxu1 %v220_v61 }
 0x1a6   :  { %v119_v62 = vpop.permute.xlu2 %118 }
 0x1a7   :  { %v131_v63 = vsel %vm126_vm6, %v119_v62, 0.0  ;;  %v210_v8 = vld [vmem:[#allocation2 + $0x10] sm:$0xff] }
 0x1a8   :  { %132 = vst [vmem:[#allocation2] sm:$0xf] %v131_v63 }
 0x1ad   :  { %v192_v0 = vpop.permute.xlu1 %191  ;;  %v180_v1 = vpop.permute.xlu0 %179 }
 0x1ae   :  { %v197_v2 = vsel %vm388_vm13, %v192_v0, 0.0  ;;  %v189_v3 = vsel %vm185_vm7, %v180_v1, 0.0  ;;  %v144_v4 = vpop.permute.xlu2 %143 }
 0x1af   :  { %198 = vst [vmem:[#allocation2 + $0x1c] sm:$0xf] %v197_v2  ;;  %v152_v5 = vsel %vm149_vm9, %v144_v4, 0.0 }
 0x1b0   :  { %190 = vst [vmem:[#allocation2 + $0x18] sm:$0xf] %v189_v3 }
 0x1b1   :  { %153 = vst [vmem:[#allocation2 + $0x8] sm:$0xf] %v152_v5 }
 0x1b5   :  { %v134_v6 = vpop.permute.xlu1 %133 }
 0x1b6   :  { %v141_v7 = vsel %vm398_vm4, %v134_v6, 0.0 }
 0x1b7   :  { %142 = vst [vmem:[#allocation2 + $0x4] sm:$0xf] %v141_v7  ;;  %v211_v9 = vld [vmem:[#allocation2 + $0x18] sm:$0xff] }
 0x1b8   :  { %v214_v10 = vpack.c.bf16 %v211_v9, %v210_v8 }
 0x1ba   :  { %228 = vmatpush.bf16.msra.mxu1 %v214_v10 }
 0x1bd   :  { %v155_v11 = vpop.permute.xlu1 %154 }
 0x1be   :  { %v163_v12 = vsel %vm159_vm0, %v155_v11, 0.0  ;;  %v208_v13 = vld [vmem:[#allocation2] sm:$0xff] }
 0x1bf   :  { %164 = vst [vmem:[#allocation2 + $0xc] sm:$0xf] %v163_v12 }
 0x1c5   :  { %v264_v33 = vpop.permute.xlu1 %263 }
 0x1c6   :  { %v209_v14 = vld [vmem:[#allocation2 + $0x8] sm:$0xff] }
 0x1c7   :  { %v213_v15 = vpack.c.bf16 %v209_v14, %v208_v13 }
 0x1c9   :  { %229 = vmatpush.bf16.msra.mxu1 %v213_v15 }
 0x1cc   :  { %298 = vmatmul.msk.bf16.vlgmr.msra.gmra.mxu1 %vm45_vm1, %v207_v16 }
 0x1cd   :  { %v270_v41 = vpop.permute.xlu1 %269 }
 0x249   :  { %v231_v18 = vpop.f32.mrf.mxu1 }
 0x24a   :  { %v235_v19 = vadd.f32 %v231_v18, %v64_v17 }
 0x24c   :  { %238 = vadd.xlane.f32.xlu2 %v235_v19  ;;  %v240_v20 = vmul.f32 %v235_v19, %v235_v19 }
 0x24e   :  { %241 = vadd.xlane.f32.xlu0 %v240_v20 }
 0x251   :  { %v233_v21 = vpop.f32.mrf.mxu1 }
 0x2bf   :  { %v239_v22 = vpop.xlane.xlu2 %238 }
 0x2c0   :  { %v243_v23 = vmul.f32 0.0078125, %v239_v22 }
 0x2c1   :  { %v242_v24 = vpop.xlane.xlu0 %241 }
 0x2c2   :  { %v245_v25 = vmul.f32 %v243_v23, %v243_v23  ;;  %v244_v26 = vmul.f32 0.0078125, %v242_v24  ;;  %v248_v37 = vsub.f32 %v235_v19, %v243_v23 }
 0x2c4   :  { %v246_v27 = vsub.f32 %v244_v26, %v245_v25 }
 0x2c6   :  { %v247_v28 = vmax.f32 %v246_v27, 0.0 }
 0x2c8   :  { %v249_v29 = vadd.f32 0.0001, %v247_v28 }
 0x2ca   :  { %318 = vrsqrt.f32 %v249_v29  ;;  %vm256_vm8 = vweird.f32 %v249_v29 }
 0x2d0   :  { %v319_v30 = vpop.eup %318 }
 0x2d1   :  { %v251_v31 = vmul.f32 %v319_v30, %v249_v29  ;;  %vm257_vm1 = vweird.f32 %v319_v30 }
 0x2d2   :  { %vm258_vm10 = vmor %vm256_vm8, %vm257_vm1 }
 0x2d3   :  { %v252_v32 = vmul.f32 %v319_v30, %v251_v31 }
 0x2d5   :  { %v253_v34 = vmul.f32 0.5, %v252_v32 }
 0x2d7   :  { %v254_v35 = vsub.f32 1.5, %v253_v34 }
 0x2d9   :  { %v255_v36 = vmul.f32 %v319_v30, %v254_v35 }
 0x2db   :  { %v259_v38 = vsel %vm258_vm10, %v319_v30, %v255_v36 }
 0x2dc   :  { %v260_v39 = vmul.f32 %v259_v38, %v248_v37 }
 0x2de   :  { %v266_v40 = vmul.f32 %v264_v33, %v260_v39 }
 0x2e0   :  { %v272_v42 = vadd.f32 %v270_v41, %v266_v40 }
 0x2e2   :  { %v274_v43 = vmin.f32 %v272_v42, 0.0  ;;  %vm273_vm11 = vcmp.gt.f32.partialorder %v272_v42, 0.0 }
 0x2e4   :  { %v275_v44 = vmul.f32 1.442695, %v274_v43 }
 0x2e6   :  { %320 = vpow2.f32 %v275_v44 }
 0x2ec   :  { %v321_v45 = vpop.eup %320 }
 0x2ed   :  { %v299_v46 = vadd.f32 -1.0, %v321_v45 }
 0x2ef   :  { %v278_v47 = vsel %vm273_vm11, %v272_v42, %v299_v46 }
 0x2f0   :  { %279 = vst [vmem:[%s430_s4] sm:$0xff] %v278_v47 }

</bundles_post_ra>
